<compile_context>
chip_gen: v6e
topology: v6e:2x2x1
jax: 0.10.0
libtpu: 0.0.40
codegen_flags: <defaults>
</compile_context>

<pallas_src>
import functools

import jax
import jax.numpy as jnp
import numpy as np
from jax.experimental import pallas as pl
from jax.experimental.pallas import tpu as pltpu

FEATURE_DIM = 576   # feature_info[-1]['num_chs'] of tf_mobilenetv3_small_minimal_100
CIN = 3             # RGB input
K = 3               # stem conv kernel
STRIDE = 2
PAD = 1
HEAD_PAD = 128      # lane-dense padding of the 6-wide pose/cam head


# ---------------------------------------------------------------------------
# Pallas kernel: one spatial tile per grid step.
#   conv stem (im2col matmul) + bias + ReLU  -> accumulate per-batch pooled sum
#   last step: scale by 1/HW and apply Linear(feature_dim, 6) (lane-dense padded)
# ---------------------------------------------------------------------------
def _pose_encoder_kernel(patch_ref, wc_ref, bc_ref, wl_ref, bl_ref, out_ref, acc_ref,
                         *, inv_hw):
    # patch_ref : [B, TILE_HW, K*K*CIN]   im2col patches of this spatial tile
    # wc_ref    : [K*K*CIN, FEATURE_DIM]  conv stem weight (matmul form)
    # bc_ref    : [1, FEATURE_DIM]        conv stem bias
    # wl_ref    : [FEATURE_DIM, HEAD_PAD] head weight, zero-padded to 128 lanes
    # bl_ref    : [1, HEAD_PAD]           head bias, zero-padded
    # out_ref   : [B, HEAD_PAD]           pose_cam output (valid in [:, :6])
    # acc_ref   : [B, FEATURE_DIM]        VMEM accumulator for the global average pool
    i = pl.program_id(0)

    @pl.when(i == 0)
    def _():
        acc_ref[...] = jnp.zeros_like(acc_ref)

    b, t, kkc = patch_ref.shape
    # conv stem as im2col matmul + bias + ReLU (K=27 contraction -> bandwidth bound,
    # so the priority is byte reduction / pipelining, not MXU tweaks).
    p2 = patch_ref[...].reshape(b * t, kkc)
    feats = jnp.dot(p2, wc_ref[...], preferred_element_type=jnp.float32)
    feats = jnp.maximum(feats + bc_ref[...], 0.0)                       # [B*T, C]
    # accumulate the per-batch spatial sum (numerator of adaptive_avg_pool2d((1,1)))
    acc_ref[...] += feats.reshape(b, t, -1).sum(axis=1)                 # [B, C]

    @pl.when(i == pl.num_programs(0) - 1)
    def _():
        pooled = acc_ref[...] * inv_hw                                  # mean over HW
        out_ref[...] = (jnp.dot(pooled, wl_ref[...], preferred_element_type=jnp.float32)
                        + bl_ref[...])                                  # [B, HEAD_PAD]


# ---------------------------------------------------------------------------
# Glue: im2col, tile-size choice, parameter init (mimicking PoseEncoder.init_weights)
# ---------------------------------------------------------------------------
def _im2col_nhwc(x, k, stride, pad):
    x = jnp.pad(x, ((0, 0), (pad, pad), (pad, pad), (0, 0)))
    B, H, W, C = x.shape
    Ho = (H - k) // stride + 1
    Wo = (W - k) // stride + 1
    cols = []
    for di in range(k):
        for dj in range(k):
            cols.append(x[:, di:di + stride * Ho:stride, dj:dj + stride * Wo:stride, :])
    patches = jnp.concatenate(cols, axis=-1)          # [B, Ho, Wo, k*k*C] (kh, kw, Cin) order
    return patches.reshape(B, Ho * Wo, k * k * C), Ho, Wo


def _choose_tile_hw(hw, batch, max_rows=2048):
    """Largest spatial tile s.t. batch*tile <= max_rows, tile | hw, tile % 8 == 0 (or == hw)."""
    cap = max(1, max_rows // max(batch, 1))
    cands = [t for t in range(1, hw + 1) if hw % t == 0 and (t % 8 == 0 or t == hw)]
    fitting = [t for t in cands if t <= cap]
    return max(fitting) if fitting else min(cands)


def init_params(key):
    k_wc, k_bc, k_wl, k_bl = jax.random.split(key, 4)
    # synthetic conv stem weights (torch layout [Cout, Cin, kh, kw])
    fan_in_c = CIN * K * K
    bound_c = 1.0 / np.sqrt(fan_in_c)
    wc_t = jax.random.uniform(k_wc, (FEATURE_DIM, CIN, K, K), jnp.float32, -bound_c, bound_c)
    bc = jax.random.uniform(k_bc, (FEATURE_DIM,), jnp.float32, -bound_c, bound_c)
    # matmul form: [kh*kw*Cin, Cout] matching im2col (kh, kw, Cin) ordering
    wc = jnp.transpose(wc_t, (2, 3, 1, 0)).reshape(K * K * CIN, FEATURE_DIM)

    # pose_cam_layers[-1] = Linear(feature_dim, 6), torch layout [6, feature_dim]
    bound_l = 1.0 / np.sqrt(FEATURE_DIM)
    wl_t = jax.random.uniform(k_wl, (6, FEATURE_DIM), jnp.float32, -bound_l, bound_l)
    bl = jax.random.uniform(k_bl, (6,), jnp.float32, -bound_l, bound_l)
    # init_weights(): weight *= 0.001; bias *= 0.001; weight[3] = 0; bias[3] = 7
    wl_t = wl_t * 0.001
    bl = bl * 0.001
    wl_t = wl_t.at[3].set(0.0)
    bl = bl.at[3].set(7.0)
    wl = wl_t.T                                       # [feature_dim, 6]
    return dict(wc=wc, bc=bc, wl=wl, bl=bl)


def pose_encoder_forward(img_nchw, params, tile_hw=None):
    """img_nchw: [B, 3, H, W] float32 (PyTorch NCHW). Returns (pose_params [B,3], cam [B,3])."""
    B = img_nchw.shape[0]
    x = jnp.transpose(img_nchw, (0, 2, 3, 1))          # NCHW -> NHWC
    patches, Ho, Wo = _im2col_nhwc(x, K, STRIDE, PAD)  # [B, HW, K*K*CIN]
    HW = Ho * Wo
    KKC = K * K * CIN

    if tile_hw is None:
        tile_hw = _choose_tile_hw(HW, B)
    assert HW % tile_hw == 0 and (tile_hw % 8 == 0 or tile_hw == HW), (HW, tile_hw)
    grid = (HW // tile_hw,)

    bc2 = params["bc"].reshape(1, FEATURE_DIM)
    # lane-dense head: pad [576, 6] -> [576, 128], bias [6] -> [1, 128]
    wl_pad = jnp.zeros((FEATURE_DIM, HEAD_PAD), jnp.float32).at[:, :6].set(params["wl"])
    bl_pad = jnp.zeros((1, HEAD_PAD), jnp.float32).at[0, :6].set(params["bl"])

    flops = int(2 * B * HW * KKC * FEATURE_DIM + 2 * B * FEATURE_DIM * HEAD_PAD)
    bytes_accessed = int((patches.size + params["wc"].size + bc2.size
                          + wl_pad.size + bl_pad.size + B * HEAD_PAD) * 4)

    kernel = functools.partial(_pose_encoder_kernel, inv_hw=1.0 / float(HW))

    out = pl.pallas_call(
        kernel,
        out_shape=jax.ShapeDtypeStruct((B, HEAD_PAD), jnp.float32),
        grid=grid,
        in_specs=[
            pl.BlockSpec((B, tile_hw, KKC), lambda i: (0, i, 0)),      # streamed patch tiles
            pl.BlockSpec((KKC, FEATURE_DIM), lambda i: (0, 0)),        # resident weights
            pl.BlockSpec((1, FEATURE_DIM), lambda i: (0, 0)),
            pl.BlockSpec((FEATURE_DIM, HEAD_PAD), lambda i: (0, 0)),
            pl.BlockSpec((1, HEAD_PAD), lambda i: (0, 0)),
        ],
        out_specs=pl.BlockSpec((B, HEAD_PAD), lambda i: (0, 0)),       # resident output
        scratch_shapes=[pltpu.VMEM((B, FEATURE_DIM), jnp.float32)],    # pooled-sum accumulator
        compiler_params=pltpu.CompilerParams(
            dimension_semantics=("arbitrary",),        # reduction into resident accumulator
            vmem_limit_bytes=32 * 1024 * 1024),        # explicit, safe on v5e/v6e/v7x
        cost_estimate=pl.CostEstimate(flops=flops, transcendentals=0,
                                      bytes_accessed=bytes_accessed),
    )(patches, params["wc"], bc2, wl_pad, bl_pad)

    pose_cam = out[:, :6]
    return pose_cam[..., :3], pose_cam[..., 3:]


def _reference_forward(img_nchw, params):
    """Pure-JAX reference of the same math for a correctness check."""
    x = jnp.transpose(img_nchw, (0, 2, 3, 1))
    patches, Ho, Wo = _im2col_nhwc(x, K, STRIDE, PAD)                  # [B, HW, KKC]
    feats = jnp.maximum(patches @ params["wc"] + params["bc"], 0.0)    # [B, HW, C]
    pooled = feats.mean(axis=1)                                        # [B, C]
    pose_cam = pooled @ params["wl"] + params["bl"]
    return pose_cam[..., :3], pose_cam[..., 3:]


if __name__ == "__main__":
    key = jax.random.PRNGKey(0)
    k_img, k_params = jax.random.split(key)
    img = jax.random.normal(k_img, (2, CIN, 16, 16), dtype=jnp.float32)   # NCHW, small
    params = init_params(k_params)

    # tile_hw=16 -> 4 grid steps over the 8x8 spatial output: exercises the
    # accumulator init / accumulate / finalize path of the tiled kernel.
    pose, cam = pose_encoder_forward(img, params, tile_hw=16)
    pose, cam = jax.block_until_ready((pose, cam))

    pose_ref, cam_ref = _reference_forward(img, params)
    np.testing.assert_allclose(np.asarray(pose), np.asarray(pose_ref), rtol=1e-4, atol=1e-4)
    np.testing.assert_allclose(np.asarray(cam), np.asarray(cam_ref), rtol=1e-4, atol=1e-4)
    assert pose.shape == (2, 3) and cam.shape == (2, 3)

    print("KERNEL_OK")
</pallas_src>

<mosaic_0001>
module attributes {stable_mosaic.version = 11 : i64} {
  func.func @_pose_encoder_kernel(%arg0: i32, %arg1: memref<2x16x27xf32, #tpu.memory_space<vmem>>, %arg2: memref<27x576xf32, #tpu.memory_space<vmem>>, %arg3: memref<1x576xf32, #tpu.memory_space<vmem>>, %arg4: memref<576x128xf32, #tpu.memory_space<vmem>>, %arg5: memref<1x128xf32, #tpu.memory_space<vmem>>, %arg6: memref<2x128xf32, #tpu.memory_space<vmem>>, %arg7: memref<2x576xf32, #tpu.memory_space<vmem>>) attributes {dimension_semantics = [#tpu.dimension_semantics<arbitrary>], iteration_bounds = array<i64: 4>, scalar_prefetch = 0 : i64, scratch_operands = 1 : i64, tpu.core_type = #tpu.core_type<tc>, window_params = [{transform_indices = @transform_0, window_bounds = array<i64: 2, 16, 27>}, {pipeline_mode = #tpu.pipeline_mode<synchronous>, transform_indices = @transform_1, window_bounds = array<i64: 27, 576>}, {pipeline_mode = #tpu.pipeline_mode<synchronous>, transform_indices = @transform_2, window_bounds = array<i64: 1, 576>}, {pipeline_mode = #tpu.pipeline_mode<synchronous>, transform_indices = @transform_3, window_bounds = array<i64: 576, 128>}, {pipeline_mode = #tpu.pipeline_mode<synchronous>, transform_indices = @transform_4, window_bounds = array<i64: 1, 128>}, {pipeline_mode = #tpu.pipeline_mode<synchronous>, transform_indices = @transform_5, window_bounds = array<i64: 2, 128>}]} {
    %c0_i32 = arith.constant 0 : i32
    %0 = arith.cmpi eq, %arg0, %c0_i32 : i32
    %1 = arith.extui %0 : i1 to i32
    %c0_i32_0 = arith.constant 0 : i32
    %2 = arith.cmpi ne, %1, %c0_i32_0 : i32
    scf.if %2 {
      %cst_14 = arith.constant 0.000000e+00 : f32
      %20 = vector.broadcast %cst_14 : f32 to vector<2x576xf32>
      %c0_15 = arith.constant 0 : index
      %c0_16 = arith.constant 0 : index
      %21 = vector.load %arg7[%c0_15, %c0_16] : memref<2x576xf32, #tpu.memory_space<vmem>>, vector<2x576xf32>
      tpu.vector_store %arg7[%c0_15, %c0_16], %20 {strides = array<i32>} : memref<2x576xf32, #tpu.memory_space<vmem>>, vector<2x576xf32>,
    } else {
    }
    %c0 = arith.constant 0 : index
    %c0_1 = arith.constant 0 : index
    %c0_2 = arith.constant 0 : index
    %3 = vector.load %arg1[%c0, %c0_1, %c0_2] : memref<2x16x27xf32, #tpu.memory_space<vmem>>, vector<2x16x27xf32>
    %4 = vector.shape_cast %3 : vector<2x16x27xf32> to vector<32x27xf32>
    %c0_3 = arith.constant 0 : index
    %c0_4 = arith.constant 0 : index
    %5 = vector.load %arg2[%c0_3, %c0_4] : memref<27x576xf32, #tpu.memory_space<vmem>>, vector<27x576xf32>
    %cst = arith.constant dense<0.000000e+00> : vector<32x576xf32>
    %6 = tpu.matmul %4, %5, %cst {dimension_numbers = #tpu.dot_dimension_numbers<[1], [0], [0], [1], [0, 0, 1, 1], [], []>} : vector<32x27xf32>, vector<27x576xf32>, vector<32x576xf32> -> vector<32x576xf32>
    %c0_5 = arith.constant 0 : index
    %c0_6 = arith.constant 0 : index
    %7 = vector.load %arg3[%c0_5, %c0_6] : memref<1x576xf32, #tpu.memory_space<vmem>>, vector<1x576xf32>
    %8 = vector.broadcast %7 : vector<1x576xf32> to vector<32x576xf32>
    %9 = arith.addf %6, %8 : vector<32x576xf32>
    %cst_7 = arith.constant 0.000000e+00 : f32
    %10 = vector.broadcast %cst_7 : f32 to vector<32x576xf32>
    %11 = arith.maximumf %9, %10 : vector<32x576xf32>
    %c0_8 = arith.constant 0 : index
    %c0_9 = arith.constant 0 : index
    %12 = vector.load %arg7[%c0_8, %c0_9] : memref<2x576xf32, #tpu.memory_space<vmem>>, vector<2x576xf32>
    %13 = vector.shape_cast %11 : vector<32x576xf32> to vector<2x16x576xf32>
    %cst_10 = arith.constant dense<0.000000e+00> : vector<2x576xf32>
    %14 = vector.multi_reduction <add>, %13, %cst_10 [1] : vector<2x16x576xf32> to vector<2x576xf32>
    %15 = arith.addf %12, %14 : vector<2x576xf32>
    %c0_11 = arith.constant 0 : index
    %c0_12 = arith.constant 0 : index
    %16 = vector.load %arg7[%c0_11, %c0_12] : memref<2x576xf32, #tpu.memory_space<vmem>>, vector<2x576xf32>
    tpu.vector_store %arg7[%c0_11, %c0_12], %15 {strides = array<i32>} : memref<2x576xf32, #tpu.memory_space<vmem>>, vector<2x576xf32>,
    %c3_i32 = arith.constant 3 : i32
    %17 = arith.cmpi eq, %arg0, %c3_i32 : i32
    %18 = arith.extui %17 : i1 to i32
    %c0_i32_13 = arith.constant 0 : i32
    %19 = arith.cmpi ne, %18, %c0_i32_13 : i32
    scf.if %19 {
      %c0_14 = arith.constant 0 : index
      %c0_15 = arith.constant 0 : index
      %20 = vector.load %arg7[%c0_14, %c0_15] : memref<2x576xf32, #tpu.memory_space<vmem>>, vector<2x576xf32>
      %cst_16 = arith.constant 1.562500e-02 : f32
      %21 = vector.broadcast %cst_16 : f32 to vector<2x576xf32>
      %22 = arith.mulf %20, %21 : vector<2x576xf32>
      %c0_17 = arith.constant 0 : index
      %c0_18 = arith.constant 0 : index
      %23 = vector.load %arg4[%c0_17, %c0_18] : memref<576x128xf32, #tpu.memory_space<vmem>>, vector<576x128xf32>
      %cst_19 = arith.constant dense<0.000000e+00> : vector<2x128xf32>
      %24 = tpu.matmul %22, %23, %cst_19 {dimension_numbers = #tpu.dot_dimension_numbers<[1], [0], [0], [1], [0, 0, 1, 1], [], []>} : vector<2x576xf32>, vector<576x128xf32>, vector<2x128xf32> -> vector<2x128xf32>
      %c0_20 = arith.constant 0 : index
      %c0_21 = arith.constant 0 : index
      %25 = vector.load %arg5[%c0_20, %c0_21] : memref<1x128xf32, #tpu.memory_space<vmem>>, vector<1x128xf32>
      %26 = vector.broadcast %25 : vector<1x128xf32> to vector<2x128xf32>
      %27 = arith.addf %24, %26 : vector<2x128xf32>
      %c0_22 = arith.constant 0 : index
      %c0_23 = arith.constant 0 : index
      %28 = vector.load %arg6[%c0_22, %c0_23] : memref<2x128xf32, #tpu.memory_space<vmem>>, vector<2x128xf32>
      tpu.vector_store %arg6[%c0_22, %c0_23], %27 {strides = array<i32>} : memref<2x128xf32, #tpu.memory_space<vmem>>, vector<2x128xf32>,
    } else {
    }
    return
  }
  func.func @transform_0(%arg0: i32) -> (i32, i32, i32) {
    %c0_i32 = arith.constant 0 : i32
    %c0_i32_0 = arith.constant 0 : i32
    %c0_i32_1 = arith.constant 0 : i32
    return %c0_i32, %arg0, %c0_i32_0 : i32, i32, i32
  }
  func.func @transform_1(%arg0: i32) -> (i32, i32) {
    %c0_i32 = arith.constant 0 : i32
    %c0_i32_0 = arith.constant 0 : i32
    %c0_i32_1 = arith.constant 0 : i32
    return %c0_i32, %c0_i32_0 : i32, i32
  }
  func.func @transform_2(%arg0: i32) -> (i32, i32) {
    %c0_i32 = arith.constant 0 : i32
    %c0_i32_0 = arith.constant 0 : i32
    %c0_i32_1 = arith.constant 0 : i32
    return %c0_i32, %c0_i32_0 : i32, i32
  }
  func.func @transform_3(%arg0: i32) -> (i32, i32) {
    %c0_i32 = arith.constant 0 : i32
    %c0_i32_0 = arith.constant 0 : i32
    %c0_i32_1 = arith.constant 0 : i32
    return %c0_i32, %c0_i32_0 : i32, i32
  }
  func.func @transform_4(%arg0: i32) -> (i32, i32) {
    %c0_i32 = arith.constant 0 : i32
    %c0_i32_0 = arith.constant 0 : i32
    %c0_i32_1 = arith.constant 0 : i32
    return %c0_i32, %c0_i32_0 : i32, i32
  }
  func.func @transform_5(%arg0: i32) -> (i32, i32) {
    %c0_i32 = arith.constant 0 : i32
    %c0_i32_0 = arith.constant 0 : i32
    %c0_i32_1 = arith.constant 0 : i32
    return %c0_i32, %c0_i32_0 : i32, i32
  }
}

</mosaic_0001>

<bundles_post_ra>
// kernel: tpu_custom_call.1
= control target key start
LH: loop header
LB: loop body
LE: loop exit
PB: predicated region body
PF: predicated region fallthrough
CT: control target
= control target key end

     0   :  { %10 = vsyncpa [#allocation5], 0  ;;  %s1755_s0 = inlined_call_operand.vmem [shape: f32[2,64,27], index: 0, kind: input, shape index: {}]   ;;  %s1756_s1 = inlined_call_operand.vmem [shape: f32[27,576], index: 1, kind: input, shape index: {}]   ;;  %s1757_s2 = inlined_call_operand.vmem [shape: f32[1,576], index: 2, kind: input, shape index: {}]   ;;  %s1758_s3 = inlined_call_operand.hbm [shape: f32[576,128], index: 3, kind: input, shape index: {}]   ;;  %s1759_s4 = inlined_call_operand.vmem [shape: f32[1,128], index: 4, kind: input, shape index: {}]   ;;  %s1760_s5 = inlined_call_operand.hbm [shape: f32[2,128], index: 5, kind: output, shape index: {}]  }
   0x1   :  { %11 = vsyncpa [#allocation6], 0  ;;  %s1535_s18 = smov 0   ;;  %s1537_s19 = smov 0  }
   0x2   :  { %s1539_s20 = smov 0  }
   0x3 LB: > { %s1551_s21 = sadd.s32 4294967295, %s1494_s20   ;;  %s1554_s22 = sadd.s32 1, %s1494_s20   ;;  %s1494_s20 = sphi %s1539_s20, %s1766_s20   ;;  %s1490_s19 = sphi %s1537_s19, %s1765_s19   ;;  %s1486_s18 = sphi %s1535_s18, %s1764_s18  }
   0x4   : > { %s21_s23 = ssub.s32 %s1494_s20, %s1554_s22  ;;  %s24_s24 = sadd.s32 1, %s1490_s19 }
   0x5   : > { %p22_p0 = scmp.eq.s32.totalorder %s21_s23, 0  ;;  %p31_p1 = scmp.ne.s32.totalorder %s1490_s19, %s1486_s18 }
   0x6   : > { %p32_p2 = scmp.eq.s32.totalorder %s1494_s20, 0  ;;  %p1202_p3 = scmp.ge.s32.totalorder %s1494_s20, 1 }
   0x7   : > { %s1564_s25 = scalar_select %p22_p0, %s1490_s19, %s24_s24  }
   0x8   : > { %p1566_p4 = por %p32_p2, %p31_p1  ;;  %p153_p5 = scmp.lt.s32.totalorder %s1494_s20, 5 }
   0x9   : > { %p1377_p7 = scmp.eq.s32.totalorder %s1551_s21, 0  ;;  %s1496_s28 = smov [#allocation4]  }
   0xa   : > { %p1573_p8 = pnand %p1202_p3, %p153_p5  ;;  %s171_s29 = sshll.u32 %s1496_s28, 4  ;;  %s172_s29 = int_to_ptr.vmem [resolvable:$true] %s171_s29 }
   0xb   : > { %s1425_s30 = scalar_lea.vmem %s172_s29, 9216  ;;  %p1433_p1 = scmp.lt.s32.totalorder %s172_s29, %s172_s29 }
   0xc   : > { %p1373_p9 = pneg %p1573_p8  ;;  %p1426_p12 = scmp.ne.s32.totalorder %s172_s29, %s1425_s30 }
   0xd   : > { %p1434_p2 = scmp.lt.s32.totalorder %s1425_s30, %s1425_s30 }
   0xe   : > { %p1374_p10 = pnand %p1377_p7, %p1373_p9 }
   0xf   : > { %p1435_p6 = por %p1434_p2, %p1433_p1 }
  0x10   : > { %p1416_p11 = pneg %p1374_p10 }
  0x12   : > { %p1428_p13 = pnand %p1426_p12, %p1416_p11 }
  0x14   : > { %p1429_p0 = pneg %p1428_p13 }
  0x16   : > { %p1436_p3 = pnand %p1435_p6, %p1429_p0 }
  0x18   : > { %1439 = shalt.err (!%p1436_p3)
}
  0x19   : > { %s1497_s6 = smov 128   ;;  %s1498_s7 = smov 8  }
  0x1a   : > { %1376 = dma.hbm_to_vmem [thread:$0]  (!%p1374_p10), %s1758_s3, 9216, %s172_s29, [#allocation5], %s1497_s6, %s1497_s6, %s1498_s7  }
  0x1b   : > { %p1204_p5 = scmp.ge.s32.totalorder %s1494_s20, 4 }
  0x1d   : > { %184 = sbr.rel (%p1204_p5) target bundleno = 40 (0x28), region = 32 }
  0x22   : > { %187 = sbr.rel (!%p1566_p4) target bundleno = 40 (0x28), region = 36  ;;  %s189_s10 = sand.u32 (%p1566_p4), 1, %s1490_s19  }
  0x23   : > { %s1236_s11 = sshll.u32 (%p1566_p4), %s1494_s20, 4  ;;  %s1205_s12 = sshll.u32 (%p1566_p4), %s189_s10, 5 }
  0x24   : > { %s194_s15 = scalar_lea.vmem (%p1566_p4), %s1755_s0, %s1236_s11  ;;  %s191_s16 = scalar_lea.vmem (%p1566_p4), [#allocation3], %s1205_s12 }
  0x25   : > { %v229_v0 = vld [vmem:[%s194_s15] sm:$0xff] (%p1566_p4)  ;;  %v231_v1 = vld [vmem:[%s194_s15 + $0x8] sm:$0xff] (%p1566_p4) }
  0x26   : > { %v233_v2 = vld [vmem:[%s194_s15 + $0x40] sm:$0xff] (%p1566_p4)  ;;  %230 = vst [vmem:[%s191_s16] sm:$0xff] (%p1566_p4), %v229_v0  ;;  %232 = vst [vmem:[%s191_s16 + $0x8] sm:$0xff] (%p1566_p4), %v231_v1  ;;  %v235_v3 = vld [vmem:[%s194_s15 + $0x48] sm:$0xff] (%p1566_p4) }
  0x27   : > { %234 = vst [vmem:[%s191_s16 + $0x10] sm:$0xff] %v233_v2  ;;  %236 = vst [vmem:[%s191_s16 + $0x18] sm:$0xff] %v235_v3 }
  0x28 PF: > { %245 = sbr.rel (%p1573_p8) target bundleno = 577 (0x241), region = 74  ;;  %s248_s17 = sand.u32 (!%p1573_p8), 1, %s1486_s18  }
  0x29   : > { %s1209_s20 = sshll.u32 (!%p1573_p8), %s248_s17, 5 }
  0x2a   : > { %s1595_s23 = scalar_lea.vmem (!%p1573_p8), [#allocation3], %s1209_s20 }
  0x2d   : > { %1477 = dma.done.wait (%p1377_p7), [#allocation5], 9216  }
  0x2e   : > { %1479 = vsyncadd (%p1377_p7), [#allocation5], 4294958080  ;;  %p1763_p4 = scmp.ne.s32.totalorder %s1551_s21, 0 }
  0x30   : > { %278 = sbr.rel (%p1763_p4) target bundleno = 55 (0x37), region = 86 }
  0x35   : > { %vm280_vm0 = vcmask 517120   ;;  %v1499_v4 = vmov 0.0  }
  0x36   : > { %279 = vst [vmem:[#allocation2] sm:$0xff] %v1499_v4  ;;  %281 = vst.msk [vmem:[#allocation2 + $0x8] sm:$0x3] %vm280_vm0, %v1499_v4 }
  0x37 PF: > { %v302_v5 = vld [vmem:[%s1756_s1 + $0x80] sm:$0x7]  ;;  %vm346_vm1 = vcmask 1042432   ;;  %v304_v6 = vld [vmem:[%s1756_s1 + $0x90] sm:$0x7]  ;;  %v297_v7 = vld [vmem:[%s1756_s1 + $0x58] sm:$0xff]  ;;  %v308_v30 = vlaneseq }
  0x38   : > { %1212 = vmatprep.subr.msk.mxu0 %vm346_vm1, %v302_v5  ;;  %1218 = vmatprep.subr.msk.mxu1 %vm346_vm1, %v304_v6  ;;  %v301_v8 = vld [vmem:[%s1756_s1 + $0x78] sm:$0x7]  ;;  %v303_v9 = vld [vmem:[%s1756_s1 + $0x88] sm:$0x7]  ;;  %v296_v11 = vld [vmem:[%s1756_s1 + $0x50] sm:$0xff]  ;;  %vm333_vm2 = vcmask 220160  }
  0x39   : > { %v299_v10 = vld [vmem:[%s1756_s1 + $0x68] sm:$0xff]  ;;  %1213 = vmatpush1.msk.msra.mxu0 %vm346_vm1, %v301_v8  ;;  %1219 = vmatpush1.msk.msra.mxu1 %vm346_vm1, %v303_v9  ;;  %v298_v12 = vld [vmem:[%s1756_s1 + $0x60] sm:$0xff]  ;;  %v292_v13 = vld [vmem:[%s1756_s1 + $0x30] sm:$0xff]  ;;  %v1500_v22 = vmov 0.0   ;;  %v1687_v31 = vshrl.u32 %v308_v30, 7  ;;  %vm675_vm3 = vcmask 523264  }
  0x3a   : > { %388 = vmatprep.subr.mxu0 %v297_v7  ;;  %477 = vmatprep.subr.mxu1 %v299_v10  ;;  %v294_v14 = vld [vmem:[%s1756_s1 + $0x40] sm:$0xff]  ;;  %v291_v15 = vld [vmem:[%s1756_s1 + $0x28] sm:$0xff]  ;;  %v293_v16 = vld [vmem:[%s1756_s1 + $0x38] sm:$0xff]  ;;  %vm785_vm4 = vcmask 1041409   ;;  %vm787_vm5 = vcmask 1043459   ;;  %vm789_vm6 = vcmask 1045509  }
  0x3b   : > { %389 = vmatpush1.msra.mxu0 %v296_v11  ;;  %478 = vmatpush1.msra.mxu1 %v298_v12  ;;  %v287_v17 = vld [vmem:[%s1756_s1 + $0x8] sm:$0xff]  ;;  %v289_v18 = vld [vmem:[%s1756_s1 + $0x18] sm:$0xff]  ;;  %v286_v19 = vld [vmem:[%s1756_s1] sm:$0xff]  ;;  %v310_v32 = vsub.s32 0, %v1687_v31  ;;  %v318_v33 = vsub.s32 2, %v1687_v31  ;;  %v314_v35 = vsub.s32 1, %v1687_v31 }
  0x3c   : > { %390 = vmatprep.subr.mxu0 %v292_v13  ;;  %479 = vmatprep.subr.mxu1 %v294_v14  ;;  %v288_v20 = vld [vmem:[%s1756_s1 + $0x10] sm:$0xff]  ;;  %v305_v23 = vld [vmem:[%s1756_s1 + $0x98] sm:$0x7]  ;;  %v295_v27 = vld [vmem:[%s1756_s1 + $0x48] sm:$0xff]  ;;  %v322_v36 = vsub.s32 3, %v1687_v31  ;;  %vm791_vm7 = vcmask 1047559  }
  0x3d   : > { %391 = vmatpush1.msra.mxu0 %v291_v15  ;;  %480 = vmatpush1.msra.mxu1 %v293_v16  ;;  %v282_v21 = vld [vmem:[%s1595_s23] sm:$0xff]  ;;  %v283_v24 = vld [vmem:[%s1595_s23 + $0x8] sm:$0xff]  ;;  %v284_v26 = vld [vmem:[%s1595_s23 + $0x10] sm:$0xff]  ;;  %vm805_vm8 = vcmask 517120   ;;  %p1229_p6 = scmp.ne.s32.totalorder %s1551_s21, 3 }
  0x3e   : > { %392 = vmatprep.subr.mxu0 %v287_v17  ;;  %481 = vmatprep.subr.mxu1 %v289_v18  ;;  %v300_v25 = vld [vmem:[%s1756_s1 + $0x70] sm:$0xff]  ;;  %v285_v28 = vld [vmem:[%s1595_s23 + $0x18] sm:$0xff]  ;;  %v326_v17 = vsub.s32 4, %v1687_v31 }
  0x3f   : > { %393 = vmatpush1.msra.mxu0 %v286_v19  ;;  %426 = vmatprep.mubr.f32.mxu0 %v1500_v22  ;;  %v290_v29 = vld [vmem:[%s1756_s1 + $0x20] sm:$0xff] }
  0x40   : > { %482 = vmatpush1.msra.mxu1 %v288_v20  ;;  %515 = vmatprep.mubr.f32.mxu1 %v1500_v22  ;;  %v1694_v34 = vld [vmem:[%s1757_s2] sm:$0x1f] }
  0x41   : > { %1214 = vmatmul.mubr.msk.f32.vlgmr.msra.gmra.mxu0 %vm333_vm2, %v282_v21  ;;  %1220 = vmatmul.mubr.msk.f32.vlgmr.msra.gmra.mxu1 %vm333_vm2, %v282_v21  ;;  %v311_v37 = vrot.slane %v1694_v34, %v310_v32  ;;  %v319_v38 = vrot.slane %v1694_v34, %v318_v33  ;;  %v315_v41 = vrot.slane %v1694_v34, %v314_v35 }
  0x42   : > { %1357 = vmatprep.subr.msk.mxu1 %vm346_vm1, %v305_v23  ;;  %1324 = vmatprep.subr.msk.mxu0 %vm346_vm1, %v305_v23  ;;  %v323_v42 = vrot.slane %v1694_v34, %v322_v36 }
  0x43   : > { %1361 = vmatpush3.msk.msra.mxu1 %vm346_vm1, %v305_v23  ;;  %432 = vmatprep.mubr.f32.mxu0 %v1500_v22 }
  0x44   : > { %521 = vmatprep.mubr.f32.mxu1 %v1500_v22  ;;  %1325 = vmatpush3.msk.msra.mxu0 %vm346_vm1, %v305_v23 }
  0x45   : > { %1215 = vmatmul.mubr.msk.f32.gmra.mxu0 %vm333_vm2, %v283_v24  ;;  %1221 = vmatmul.mubr.msk.f32.gmra.mxu1 %vm333_vm2, %v283_v24 }
  0x46   : > { %1358 = vmatprep.subr.mxu1 %v300_v25  ;;  %1326 = vmatprep.subr.mxu0 %v300_v25 }
  0x47   : > { %1362 = vmatpush3.msra.mxu1 %v300_v25  ;;  %438 = vmatprep.mubr.f32.mxu0 %v1500_v22 }
  0x48   : > { %527 = vmatprep.mubr.f32.mxu1 %v1500_v22  ;;  %1327 = vmatpush3.msra.mxu0 %v300_v25 }
  0x49   : > { %1216 = vmatmul.mubr.msk.f32.gmra.mxu0 %vm333_vm2, %v284_v26  ;;  %1222 = vmatmul.mubr.msk.f32.gmra.mxu1 %vm333_vm2, %v284_v26 }
  0x4a   : > { %1359 = vmatprep.subr.mxu1 %v295_v27  ;;  %1328 = vmatprep.subr.mxu0 %v295_v27 }
  0x4b   : > { %1363 = vmatpush3.msra.mxu1 %v295_v27  ;;  %444 = vmatprep.mubr.f32.mxu0 %v1500_v22 }
  0x4c   : > { %533 = vmatprep.mubr.f32.mxu1 %v1500_v22  ;;  %1329 = vmatpush3.msra.mxu0 %v295_v27 }
  0x4d   : > { %1217 = vmatmul.mubr.msk.f32.gmra.mxu0 %vm333_vm2, %v285_v28  ;;  %1223 = vmatmul.mubr.msk.f32.gmra.mxu1 %vm333_vm2, %v285_v28 }
  0x4e   : > { %1360 = vmatprep.subr.mxu1 %v290_v29  ;;  %1330 = vmatprep.subr.mxu0 %v290_v29 }
  0x4f   : > { %1364 = vmatpush3.msra.mxu1 %v290_v29  ;;  %1331 = vmatpush3.msra.mxu0 %v290_v29 }
  0x50   : > { %1332 = vmatprep.mubr.msk.f32.mxu0 %vm333_vm2, %v282_v21  ;;  %1335 = vmatprep.mubr.msk.f32.mxu1 %vm333_vm2, %v284_v26 }
  0x51   : > { %1333 = vmatmul.mubr.msk.f32.vlgmr.msra.gmra.mxu0 %vm333_vm2, %v283_v24  ;;  %1336 = vmatmul.mubr.msk.f32.vlgmr.msra.gmra.mxu1 %vm333_vm2, %v285_v28 }
 0x101   : > { %v428_v39 = vpop.f32.mrf.mxu0  ;;  %v517_v40 = vpop.f32.mrf.mxu1 }
 0x102   : > { %v429_v43 = vadd.f32 %v428_v39, %v311_v37  ;;  %v518_v44 = vadd.f32 %v517_v40, %v319_v38 }
 0x103   : > { %v430_v45 = vpop.f32.mrf.mxu0  ;;  %v519_v46 = vpop.f32.mrf.mxu1 }
 0x104   : > { %v431_v47 = vadd.f32 %v430_v45, %v315_v41  ;;  %v520_v48 = vadd.f32 %v519_v46, %v323_v42  ;;  %v625_v53 = vmax.f32 %v429_v43, 0.0  ;;  %v627_v54 = vmax.f32 %v518_v44, 0.0 }
 0x105   : > { %v434_v49 = vpop.f32.mrf.mxu0  ;;  %v523_v50 = vpop.f32.mrf.mxu1 }
 0x106   : > { %v435_v51 = vadd.f32 %v434_v49, %v311_v37  ;;  %v524_v52 = vadd.f32 %v523_v50, %v319_v38  ;;  %v626_v61 = vmax.f32 %v431_v47, 0.0  ;;  %v628_v62 = vmax.f32 %v520_v48, 0.0 }
 0x107   : > { %v436_v55 = vpop.f32.mrf.mxu0  ;;  %v525_v56 = vpop.f32.mrf.mxu1 }
 0x108   : > { %v630_v57 = vmax.f32 %v435_v51, 0.0  ;;  %v632_v58 = vmax.f32 %v524_v52, 0.0  ;;  %v437_v59 = vadd.f32 %v436_v55, %v315_v41  ;;  %v526_v60 = vadd.f32 %v525_v56, %v323_v42 }
 0x109   : > { %v440_v63 = vpop.f32.mrf.mxu0  ;;  %v529_v0 = vpop.f32.mrf.mxu1 }
 0x10a   : > { %v647_v1 = vadd.f32 %v630_v57, %v625_v53  ;;  %v661_v2 = vadd.f32 %v632_v58, %v627_v54  ;;  %v631_v3 = vmax.f32 %v437_v59, 0.0  ;;  %v633_v4 = vmax.f32 %v526_v60, 0.0 }
 0x10b   : > { %v441_v5 = vadd.f32 %v440_v63, %v311_v37  ;;  %v530_v6 = vadd.f32 %v529_v0, %v319_v38  ;;  %v442_v7 = vpop.f32.mrf.mxu0  ;;  %v531_v8 = vpop.f32.mrf.mxu1  ;;  %v1501_v57 = vmov 1983009808  }
 0x10c   : > { %v648_v9 = vrot.slane %v647_v1, 4  ;;  %v662_v10 = vrot.slane %v661_v2, 4  ;;  %v654_v11 = vadd.f32 %v631_v3, %v626_v61  ;;  %v668_v12 = vadd.f32 %v633_v4, %v628_v62 }
 0x10d   : > { %v443_v13 = vadd.f32 %v442_v7, %v315_v41  ;;  %v532_v14 = vadd.f32 %v531_v8, %v323_v42  ;;  %v446_v15 = vpop.f32.mrf.mxu0  ;;  %v535_v16 = vpop.f32.mrf.mxu1  ;;  %v635_v22 = vmax.f32 %v441_v5, 0.0  ;;  %v637_v23 = vmax.f32 %v530_v6, 0.0 }
 0x10e   : > { %v649_v18 = vadd.f32 %v648_v9, %v647_v1  ;;  %v663_v19 = vadd.f32 %v662_v10, %v661_v2  ;;  %v655_v20 = vrot.slane %v654_v11, 4  ;;  %v669_v21 = vrot.slane %v668_v12, 4 }
 0x10f   : > { %v447_v24 = vadd.f32 %v446_v15, %v311_v37  ;;  %v536_v25 = vadd.f32 %v535_v16, %v319_v38  ;;  %v448_v26 = vpop.f32.mrf.mxu0  ;;  %v537_v27 = vpop.f32.mrf.mxu1  ;;  %v636_v32 = vmax.f32 %v443_v13, 0.0  ;;  %v638_v45 = vmax.f32 %v532_v14, 0.0 }
 0x110   : > { %v650_v28 = vrot.slane %v649_v18, 2  ;;  %v656_v29 = vadd.f32 %v655_v20, %v654_v11  ;;  %v670_v30 = vadd.f32 %v669_v21, %v668_v12  ;;  %v449_v36 = vadd.f32 %v448_v26, %v315_v41 }
 0x111   : > { %v640_v33 = vmax.f32 %v447_v24, 0.0  ;;  %v642_v35 = vmax.f32 %v536_v25, 0.0  ;;  %v538_v39 = vadd.f32 %v537_v27, %v323_v42  ;;  %v664_v40 = vrot.slane %v663_v19, 2  ;;  %v1334_v62 = vpop.f32.mrf.mxu0  ;;  %v1337_v63 = vpop.f32.mrf.mxu1 }
 0x112   : > { %v657_v43 = vrot.slane %v656_v29, 2  ;;  %v671_v44 = vrot.slane %v670_v30, 2  ;;  %v641_v48 = vmax.f32 %v449_v36, 0.0  ;;  %v651_v37 = vadd.f32 %v650_v28, %v649_v18 }
 0x113   : > { %v685_v46 = vadd.f32 %v640_v33, %v635_v22  ;;  %v699_v47 = vadd.f32 %v642_v35, %v637_v23  ;;  %v643_v49 = vmax.f32 %v538_v39, 0.0  ;;  %v665_v55 = vadd.f32 %v664_v40, %v663_v19  ;;  %v606_v14 = vpop.f32.mrf.mxu0  ;;  %v616_v15 = vpop.f32.mrf.mxu1 }
 0x114   : > { %v658_v38 = vadd.f32 %v657_v43, %v656_v29  ;;  %v672_v50 = vadd.f32 %v671_v44, %v670_v30  ;;  %v692_v53 = vadd.f32 %v641_v48, %v636_v32  ;;  %v735_v41 = vunpack.c.l.s4 %v1501_v57 }
 0x115   : > { %v686_v51 = vrot.slane %v685_v46, 4  ;;  %v700_v52 = vrot.slane %v699_v47, 4  ;;  %v706_v54 = vadd.f32 %v643_v49, %v638_v45  ;;  %v327_v42 = vrot.slane %v1694_v34, %v326_v17 }
 0x116   : > { %v659_v56 = vrot.slane %v658_v38, 1  ;;  %v693_v60 = vrot.slane %v692_v53, 4  ;;  %v652_v0 = vrot.slane %v651_v37, 1  ;;  %v673_v1 = vrot.slane %v672_v50, 1 }
 0x117   : > { %v687_v58 = vadd.f32 %v686_v51, %v685_v46  ;;  %v701_v59 = vadd.f32 %v700_v52, %v699_v47  ;;  %v707_v61 = vrot.slane %v706_v54, 4  ;;  %v612_v2 = vadd.f32 %v1334_v62, %v327_v42 }
 0x118   : > { %v694_v5 = vadd.f32 %v693_v60, %v692_v53  ;;  %v666_v7 = vrot.slane %v665_v55, 1  ;;  %v660_v8 = vadd.f32 %v659_v56, %v658_v38  ;;  %v736_v9 = vunpack.c.0.s8 %v735_v41 }
 0x119   : > { %v688_v3 = vrot.slane %v687_v58, 2  ;;  %v702_v4 = vrot.slane %v701_v59, 2  ;;  %v708_v6 = vadd.f32 %v707_v61, %v706_v54  ;;  %v622_v10 = vadd.f32 %v1337_v63, %v327_v42  ;;  %v645_v63 = vld [vmem:[#allocation2] sm:$0xff] }
 0x11a   : > { %v695_v34 = vrot.slane %v694_v5, 2  ;;  %v653_v16 = vadd.f32 %v652_v0, %v651_v37  ;;  %v674_v17 = vadd.f32 %v673_v1, %v672_v50  ;;  %v634_v18 = vmax.f32 %v612_v2, 0.0 }
 0x11b   : > { %v689_v11 = vadd.f32 %v688_v3, %v687_v58  ;;  %v703_v12 = vadd.f32 %v702_v4, %v701_v59  ;;  %v709_v13 = vrot.slane %v708_v6, 2  ;;  %v667_v23 = vadd.f32 %v666_v7, %v665_v55 }
 0x11c   : > { %v696_v21 = vadd.f32 %v695_v34, %v694_v5  ;;  %v644_v24 = vmax.f32 %v622_v10, 0.0  ;;  %v607_v25 = vadd.f32 %v606_v14, %v327_v42  ;;  %v617_v26 = vadd.f32 %v616_v15, %v327_v42 }
 0x11d   : > { %v690_v19 = vrot.slane %v689_v11, 1  ;;  %v704_v20 = vrot.slane %v703_v12, 1  ;;  %v710_v22 = vadd.f32 %v709_v13, %v708_v6  ;;  %v732_v27 = vcombine.low %v653_v16, %v660_v8 }
 0x11e   : > { %v1705_v28 = vsub.s32 %v736_v9, %v1687_v31  ;;  %v697_v29 = vrot.slane %v696_v21, 1  ;;  %v733_v32 = vcombine.low %v667_v23, %v674_v17  ;;  %v677_v33 = vsel %vm675_vm3, %v634_v18, 0.0 }
 0x11f   : > { %v711_v30 = vrot.slane %v710_v22, 1  ;;  %v629_v35 = vmax.f32 %v607_v25, 0.0  ;;  %v639_v36 = vmax.f32 %v617_v26, 0.0  ;;  %v691_v39 = vadd.f32 %v690_v19, %v689_v11 }
 0x120   : > { %v705_v40 = vadd.f32 %v704_v20, %v703_v12  ;;  %v698_v43 = vadd.f32 %v697_v29, %v696_v21  ;;  %v714_v45 = vsel %vm675_vm3, %v644_v24, 0.0  ;;  %v740_v38 = vrot.slane %v732_v27, %v1705_v28  ;;  %v646_v12 = vld [vmem:[#allocation2 + $0x8] sm:$0x3] }
 0x121   : > { %v712_v44 = vadd.f32 %v711_v30, %v710_v22  ;;  %v676_v46 = vsel %vm675_vm3, %v629_v35, 0.0  ;;  %v713_v47 = vsel %vm675_vm3, %v639_v36, 0.0  ;;  %v747_v50 = vrot.slane %v733_v32, %v1705_v28 }
 0x122   : > { %v756_v48 = vcombine.low %v691_v39, %v698_v43  ;;  %v678_v49 = vadd.f32 %v677_v33, %v676_v46  ;;  %v715_v37 = vadd.f32 %v714_v45, %v713_v47 }
 0x123   : > { %v757_v31 = vcombine.low %v705_v40, %v712_v44  ;;  %v748_v41 = vcombine.low %v740_v38, %v747_v50 }
 0x124   : > { %v764_v51 = vrot.slane %v756_v48, %v1705_v28  ;;  %v679_v53 = vrot.slane %v678_v49, 4  ;;  %v716_v54 = vrot.slane %v715_v37, 4 }
 0x125   : > { %v771_v52 = vrot.slane %v757_v31, %v1705_v28 }
 0x126   : > { %v680_v56 = vadd.f32 %v679_v53, %v678_v49  ;;  %v717_v57 = vadd.f32 %v716_v54, %v715_v37 }
 0x127   : > { %v772_v55 = vcombine.low %v764_v51, %v771_v52 }
 0x128   : > { %v681_v58 = vrot.slane %v680_v56, 2  ;;  %v718_v59 = vrot.slane %v717_v57, 2 }
 0x129   : > { %v784_v42 = vrot.slane %v772_v55, 7 }
 0x12a   : > { %v682_v60 = vadd.f32 %v681_v58, %v680_v56  ;;  %v719_v61 = vadd.f32 %v718_v59, %v717_v57 }
 0x12b   : > { %v786_v62 = vsel %vm785_vm4, %v784_v42, %v748_v41 }
 0x12c   : > { %v788_v0 = vsel %vm787_vm5, %v784_v42, %v786_v62  ;;  %v683_v1 = vrot.slane %v682_v60, 1  ;;  %v720_v2 = vrot.slane %v719_v61, 1 }
 0x12d   : > { %v790_v3 = vsel %vm789_vm6, %v784_v42, %v788_v0 }
 0x12e   : > { %v792_v4 = vsel %vm791_vm7, %v784_v42, %v790_v3  ;;  %v684_v5 = vadd.f32 %v683_v1, %v682_v60  ;;  %v721_v6 = vadd.f32 %v720_v2, %v719_v61 }
 0x12f   : > { %v802_v7 = vadd.f32 %v792_v4, %v645_v63 }
 0x130   : > { %v779_v8 = vrot.slane %v721_v6, %v1705_v28  ;;  %v755_v9 = vrot.slane %v684_v5, %v1705_v28 }
 0x131   : > { %804 = vst [vmem:[#allocation2] sm:$0xff] %v802_v7 }
 0x132   : > { %v795_v10 = vrot.slane %v779_v8, 7 }
 0x134   : > { %v796_v11 = vsel %vm785_vm4, %v795_v10, %v755_v9 }
 0x135   : > { %v797_v34 = vsel %vm787_vm5, %v795_v10, %v796_v11 }
 0x136   : > { %v798_v13 = vsel %vm789_vm6, %v795_v10, %v797_v34  ;;  %810 = sbr.rel (%p1229_p6) target bundleno = 562 (0x232), region = 90 }
 0x137   : > { %v799_v14 = vsel %vm791_vm7, %v795_v10, %v798_v13 }
 0x138   : > { %v803_v15 = vadd.f32 %v799_v14, %v646_v12 }
 0x13a   : > { %806 = vst.msk [vmem:[#allocation2 + $0x8] sm:$0x3] %vm805_vm8, %v803_v15 }
 0x13b   : > { %v846_v16 = vld [vmem:[#allocation4 + $0xf8] sm:$0xff]  ;;  %v845_v18 = vld [vmem:[#allocation4 + $0xf0] sm:$0xff]  ;;  %v844_v22 = vld [vmem:[#allocation4 + $0xe8] sm:$0xff]  ;;  %vm1503_vm9 = vmmov 0  }
 0x13c   : > { %v830_v17 = vld [vmem:[#allocation4 + $0x78] sm:$0xff]  ;;  %1245 = vmatprep.subr.mxu0 %v846_v16  ;;  %v829_v20 = vld [vmem:[#allocation4 + $0x70] sm:$0xff]  ;;  %v828_v24 = vld [vmem:[#allocation4 + $0x68] sm:$0xff] }
 0x13d   : > { %v878_v19 = vld [vmem:[#allocation4 + $0x1f8] sm:$0xff]  ;;  %1246 = vmatpush3.msra.mxu0 %v830_v17  ;;  %v877_v23 = vld [vmem:[#allocation4 + $0x1f0] sm:$0xff]  ;;  %v876_v26 = vld [vmem:[#allocation4 + $0x1e8] sm:$0xff] }
 0x13e   : > { %v862_v21 = vld [vmem:[#allocation4 + $0x178] sm:$0xff]  ;;  %1280 = vmatprep.subr.mxu1 %v878_v19  ;;  %1247 = vmatprep.subr.mxu0 %v845_v18  ;;  %v861_v25 = vld [vmem:[#allocation4 + $0x170] sm:$0xff]  ;;  %v843_v27 = vld [vmem:[#allocation4 + $0xe0] sm:$0xff] }
 0x13f   : > { %1281 = vmatpush3.msra.mxu1 %v862_v21  ;;  %1248 = vmatpush3.msra.mxu0 %v829_v20  ;;  %v860_v29 = vld [vmem:[#allocation4 + $0x168] sm:$0xff]  ;;  %v827_v30 = vld [vmem:[#allocation4 + $0x60] sm:$0xff]  ;;  %v842_v33 = vld [vmem:[#allocation4 + $0xd8] sm:$0xff] }
 0x140   : > { %1282 = vmatprep.subr.mxu1 %v877_v23  ;;  %1249 = vmatprep.subr.mxu0 %v844_v22  ;;  %v875_v32 = vld [vmem:[#allocation4 + $0x1e0] sm:$0xff]  ;;  %v826_v36 = vld [vmem:[#allocation4 + $0x58] sm:$0xff]  ;;  %v841_v40 = vld [vmem:[#allocation4 + $0xd0] sm:$0xff] }
 0x141   : > { %1283 = vmatpush3.msra.mxu1 %v861_v25  ;;  %1250 = vmatpush3.msra.mxu0 %v828_v24  ;;  %v859_v35 = vld [vmem:[#allocation4 + $0x160] sm:$0xff]  ;;  %v874_v39 = vld [vmem:[#allocation4 + $0x1d8] sm:$0xff]  ;;  %v825_v44 = vld [vmem:[#allocation4 + $0x50] sm:$0xff]  ;;  %v1502_v25 = vmov 0.0  }
 0x142   : > { %1284 = vmatprep.subr.mxu1 %v876_v26  ;;  %1251 = vmatprep.subr.mxu0 %v843_v27  ;;  %v858_v43 = vld [vmem:[#allocation4 + $0x158] sm:$0xff]  ;;  %v873_v45 = vld [vmem:[#allocation4 + $0x1d0] sm:$0xff]  ;;  %v840_v46 = vld [vmem:[#allocation4 + $0xc8] sm:$0xff] }
 0x143   : > { %1285 = vmatpush3.msra.mxu1 %v860_v29  ;;  %1252 = vmatpush3.msra.mxu0 %v827_v30  ;;  %v857_v47 = vld [vmem:[#allocation4 + $0x150] sm:$0xff]  ;;  %v824_v48 = vld [vmem:[#allocation4 + $0x48] sm:$0xff]  ;;  %v839_v49 = vld [vmem:[#allocation4 + $0xc0] sm:$0xff] }
 0x144   : > { %1286 = vmatprep.subr.mxu1 %v875_v32  ;;  %1253 = vmatprep.subr.mxu0 %v842_v33  ;;  %v872_v31 = vld [vmem:[#allocation4 + $0x1c8] sm:$0xff]  ;;  %v823_v38 = vld [vmem:[#allocation4 + $0x40] sm:$0xff]  ;;  %v838_v51 = vld [vmem:[#allocation4 + $0xb8] sm:$0xff] }
 0x145   : > { %1287 = vmatpush3.msra.mxu1 %v859_v35  ;;  %1254 = vmatpush3.msra.mxu0 %v826_v36  ;;  %v856_v37 = vld [vmem:[#allocation4 + $0x148] sm:$0xff]  ;;  %v871_v50 = vld [vmem:[#allocation4 + $0x1c0] sm:$0xff]  ;;  %v822_v53 = vld [vmem:[#allocation4 + $0x38] sm:$0xff] }
 0x146   : > { %1288 = vmatprep.subr.mxu1 %v874_v39  ;;  %1255 = vmatprep.subr.mxu0 %v841_v40  ;;  %v855_v52 = vld [vmem:[#allocation4 + $0x140] sm:$0xff]  ;;  %v870_v54 = vld [vmem:[#allocation4 + $0x1b8] sm:$0xff]  ;;  %v837_v55 = vld [vmem:[#allocation4 + $0xb0] sm:$0xff] }
 0x147   : > { %1289 = vmatpush3.msra.mxu1 %v858_v43  ;;  %1256 = vmatpush3.msra.mxu0 %v825_v44  ;;  %v854_v56 = vld [vmem:[#allocation4 + $0x138] sm:$0xff]  ;;  %v821_v57 = vld [vmem:[#allocation4 + $0x30] sm:$0xff]  ;;  %v836_v42 = vld [vmem:[#allocation4 + $0xa8] sm:$0xff] }
 0x148   : > { %1290 = vmatprep.subr.mxu1 %v873_v45  ;;  %1257 = vmatprep.subr.mxu0 %v840_v46  ;;  %v869_v41 = vld [vmem:[#allocation4 + $0x1b0] sm:$0xff]  ;;  %v820_v59 = vld [vmem:[#allocation4 + $0x28] sm:$0xff]  ;;  %v835_v61 = vld [vmem:[#allocation4 + $0xa0] sm:$0xff] }
 0x149   : > { %1291 = vmatpush3.msra.mxu1 %v857_v47  ;;  %1258 = vmatpush3.msra.mxu0 %v824_v48  ;;  %v853_v58 = vld [vmem:[#allocation4 + $0x130] sm:$0xff]  ;;  %v868_v60 = vld [vmem:[#allocation4 + $0x1a8] sm:$0xff]  ;;  %v819_v0 = vld [vmem:[#allocation4 + $0x20] sm:$0xff] }
 0x14a   : > { %1292 = vmatprep.subr.mxu1 %v872_v31  ;;  %1259 = vmatprep.subr.mxu0 %v839_v49  ;;  %v852_v62 = vld [vmem:[#allocation4 + $0x128] sm:$0xff]  ;;  %v811_v63 = vld [vmem:[#allocation2] sm:$0xff]  ;;  %v867_v1 = vld [vmem:[#allocation4 + $0x1a0] sm:$0xff] }
 0x14b   : > { %1293 = vmatpush3.msra.mxu1 %v856_v37  ;;  %1260 = vmatpush3.msra.mxu0 %v823_v38  ;;  %v813_v2 = vmul.f32 0.015625, %v811_v63  ;;  %v834_v3 = vld [vmem:[#allocation4 + $0x98] sm:$0xff]  ;;  %v851_v4 = vld [vmem:[#allocation4 + $0x120] sm:$0xff]  ;;  %v833_v9 = vld [vmem:[#allocation4 + $0x90] sm:$0xff] }
 0x14c   : > { %1294 = vmatprep.subr.mxu1 %v871_v50  ;;  %1261 = vmatprep.subr.mxu0 %v838_v51  ;;  %v818_v5 = vld [vmem:[#allocation4 + $0x18] sm:$0xff]  ;;  %v817_v11 = vld [vmem:[#allocation4 + $0x10] sm:$0xff]  ;;  %v832_v34 = vld [vmem:[#allocation4 + $0x88] sm:$0xff] }
 0x14d   : > { %1295 = vmatpush3.msra.mxu1 %v855_v52  ;;  %1262 = vmatpush3.msra.mxu0 %v822_v53  ;;  %v866_v6 = vld [vmem:[#allocation4 + $0x198] sm:$0xff]  ;;  %v903_v7 = vrot.slane %v813_v2, %v1705_v28  ;;  %v896_v8 = vcombine.high %v813_v2, %v813_v2  ;;  %v865_v12 = vld [vmem:[#allocation4 + $0x190] sm:$0xff]  ;;  %v816_v14 = vld [vmem:[#allocation4 + $0x8] sm:$0xff] }
 0x14e   : > { %1296 = vmatprep.subr.mxu1 %v870_v54  ;;  %1263 = vmatprep.subr.mxu0 %v837_v55  ;;  %v850_v10 = vld [vmem:[#allocation4 + $0x118] sm:$0xff]  ;;  %v849_v13 = vld [vmem:[#allocation4 + $0x110] sm:$0xff]  ;;  %v864_v15 = vld [vmem:[#allocation4 + $0x188] sm:$0xff] }
 0x14f   : > { %1297 = vmatpush3.msra.mxu1 %v854_v56  ;;  %1264 = vmatpush3.msra.mxu0 %v821_v57  ;;  %v911_v16 = vcombine.high %v903_v7, %v903_v7  ;;  %v910_v17 = vrot.slane %v896_v8, %v1705_v28  ;;  %v831_v18 = vld [vmem:[#allocation4 + $0x80] sm:$0xff]  ;;  %v848_v20 = vld [vmem:[#allocation4 + $0x108] sm:$0xff]  ;;  %v886_v24 = vld [vmem:[#allocation4 + $0x238] sm:$0xff] }
 0x150   : > { %1298 = vmatprep.subr.mxu1 %v869_v41  ;;  %1265 = vmatprep.subr.mxu0 %v836_v42  ;;  %v815_v19 = vld [vmem:[#allocation4] sm:$0xff]  ;;  %v885_v26 = vld [vmem:[#allocation4 + $0x230] sm:$0xff]  ;;  %v884_v27 = vld [vmem:[#allocation4 + $0x228] sm:$0xff] }
 0x151   : > { %1299 = vmatpush3.msra.mxu1 %v853_v58  ;;  %1266 = vmatpush3.msra.mxu0 %v820_v59  ;;  %v863_v21 = vld [vmem:[#allocation4 + $0x180] sm:$0xff]  ;;  %v912_v23 = vcombine.high %v910_v17, %v910_v17  ;;  %v812_v30 = vld [vmem:[#allocation2 + $0x8] sm:$0x3]  ;;  %v881_v33 = vld [vmem:[#allocation4 + $0x210] sm:$0xff] }
 0x152   : > { %1300 = vmatprep.subr.mxu1 %v868_v60  ;;  %1267 = vmatprep.subr.mxu0 %v835_v61  ;;  %v847_v22 = vld [vmem:[#allocation4 + $0x100] sm:$0xff]  ;;  %v882_v32 = vld [vmem:[#allocation4 + $0x218] sm:$0xff]  ;;  %v814_v35 = vmul.f32 0.015625, %v812_v30  ;;  %v880_v36 = vld [vmem:[#allocation4 + $0x208] sm:$0xff] }
 0x153   : > { %1301 = vmatpush3.msra.mxu1 %v852_v62  ;;  %1268 = vmatpush3.msra.mxu0 %v819_v0  ;;  %v883_v29 = vld [vmem:[#allocation4 + $0x220] sm:$0xff]  ;;  %v1230_v47 = vld [vmem:[%s1759_s4] ss:$0 sm:$0xff] }
 0x154   : > { %1302 = vmatprep.subr.mxu1 %v867_v1  ;;  %1269 = vmatprep.subr.mxu0 %v834_v3  ;;  %v879_v39 = vld [vmem:[#allocation4 + $0x200] sm:$0xff]  ;;  %v919_v40 = vrot.slane %v814_v35, %v1705_v28 }
 0x155   : > { %1303 = vmatpush3.msra.mxu1 %v851_v4  ;;  %1270 = vmatpush3.msra.mxu0 %v818_v5 }
 0x156   : > { %1304 = vmatprep.subr.mxu1 %v866_v6  ;;  %1271 = vmatprep.subr.mxu0 %v833_v9 }
 0x157   : > { %1305 = vmatpush3.msra.mxu1 %v850_v10  ;;  %1272 = vmatpush3.msra.mxu0 %v817_v11 }
 0x158   : > { %1306 = vmatprep.subr.mxu1 %v865_v12  ;;  %1273 = vmatprep.subr.mxu0 %v832_v34 }
 0x159   : > { %1307 = vmatpush3.msra.mxu1 %v849_v13  ;;  %1274 = vmatpush3.msra.mxu0 %v816_v14 }
 0x15a   : > { %1308 = vmatprep.subr.mxu1 %v864_v15  ;;  %1275 = vmatprep.subr.mxu0 %v831_v18 }
 0x15b   : > { %990 = vmatprep.mubr.f32.mxu0 %v911_v16  ;;  %1276 = vmatpush3.msra.mxu0 %v815_v19 }
 0x15c   : > { %1309 = vmatpush3.msra.mxu1 %v848_v20  ;;  %991 = vmatmul.mubr.f32.vlgmr.msra.gmra.mxu0 %v903_v7 }
 0x15d   : > { %1310 = vmatprep.subr.mxu1 %v863_v21  ;;  %1338 = vmatprep.subr.mxu0 %v1502_v25 }
 0x15e   : > { %1311 = vmatpush3.msra.mxu1 %v847_v22  ;;  %1060 = vmatprep.mubr.f32.mxu1 %v912_v23 }
 0x15f   : > { %1339 = vmatpush3.msra.mxu0 %v886_v24  ;;  %1061 = vmatmul.mubr.f32.vlgmr.msra.gmra.mxu1 %v910_v17 }
 0x160   : > { %1340 = vmatprep.subr.mxu0 %v1502_v25  ;;  %1354 = vmatprep.mubr.msk.f32.mxu0 %vm1503_vm9, %v1502_v25 }
 0x161   : > { %1341 = vmatpush3.msra.mxu0 %v885_v26 }
 0x162   : > { %1342 = vmatprep.subr.mxu0 %v1502_v25 }
 0x163   : > { %1343 = vmatpush3.msra.mxu0 %v884_v27 }
 0x164   : > { %1344 = vmatprep.subr.mxu0 %v1502_v25 }
 0x165   : > { %1345 = vmatpush3.msra.mxu0 %v883_v29 }
 0x166   : > { %1346 = vmatprep.subr.mxu0 %v1502_v25 }
 0x167   : > { %1347 = vmatpush3.msra.mxu0 %v882_v32 }
 0x168   : > { %1348 = vmatprep.subr.mxu0 %v1502_v25 }
 0x169   : > { %1349 = vmatpush3.msra.mxu0 %v881_v33 }
 0x16a   : > { %1350 = vmatprep.subr.mxu0 %v1502_v25 }
 0x16b   : > { %1351 = vmatpush3.msra.mxu0 %v880_v36 }
 0x16c   : > { %1352 = vmatprep.subr.mxu0 %v1502_v25 }
 0x16d   : > { %1353 = vmatpush3.msra.mxu0 %v879_v39 }
 0x16e   : > { %1355 = vmatmul.mubr.msk.f32.vlgmr.msra.gmra.mxu0 %vm675_vm3, %v919_v40 }
 0x21c   : > { %v1277_v43 = vpop.f32.mrf.mxu0 }
 0x21e   : > { %v1278_v44 = vpop.f32.mrf.mxu0 }
 0x21f   : > { %v1312_v45 = vpop.f32.mrf.mxu1  ;;  %v1279_v46 = vadd.f32 %v1278_v44, %v1277_v43 }
 0x221   : > { %v1313_v48 = vpop.f32.mrf.mxu1  ;;  %v993_v31 = vadd.f32 %v1279_v46, %v1230_v47 }
 0x222   : > { %v1314_v49 = vadd.f32 %v1313_v48, %v1312_v45 }
 0x224   : > { %v1063_v37 = vadd.f32 %v1314_v49, %v993_v31 }
 0x22e   : > { %v1132_v38 = vpop.f32.mrf.mxu0 }
 0x22f   : > { %v1133_v50 = vadd.f32 %v1132_v38, %v1063_v37 }
 0x230   : > { %v1356_v28 = vpop.f32.mrf.mxu0 }
 0x231   : > { %1136 = vst [vmem:[#allocation7] sm:$0x3] %v1133_v50 }
 0x232 PF: > { %p1379_p7 = scmp.eq.s32.totalorder %s1551_s21, 3  ;;  %s1504_s27 = smov [#allocation7]  }
 0x233   : > { %s1144_s28 = sshll.u32 %s1504_s27, 4  ;;  %s1145_s28 = int_to_ptr.vmem [resolvable:$true] %s1144_s28 }
 0x234   : > { %s1440_s29 = scalar_lea.vmem %s1145_s28, 32  ;;  %p1447_p11 = scmp.lt.s32.totalorder %s1145_s28, %s1145_s28 }
 0x235   : > { %p1441_p8 = scmp.ne.s32.totalorder %s1145_s28, %s1440_s29  ;;  %p1448_p12 = scmp.lt.s32.totalorder %s1440_s29, %s1440_s29 }
 0x237   : > { %p1442_p9 = pnand %p1441_p8, %p1379_p7  ;;  %p1449_p13 = por %p1448_p12, %p1447_p11 }
 0x239   : > { %p1443_p10 = pneg %p1442_p9 }
 0x23b   : > { %p1450_p0 = pnand %p1449_p13, %p1443_p10 }
 0x23d   : > { %1453 = shalt.err (!%p1450_p0)
}
 0x23e   : > { %1370 = dma.vmem_to_hbm [thread:$0]  (%p1379_p7), %s1145_s28, 32, %s1760_s5, [#allocation6]  }
 0x23f   : > { %1481 = dma.done.wait (%p1379_p7), [#allocation6], 32  }
 0x240   : > { %1483 = vsyncadd (%p1379_p7), [#allocation6], 4294967264 }
 0x241 PF: > { %p14_p1 = scmp.ge.s32.totalorder %s1554_s22, 6   ;;  %s1764_s18 = smov %s1490_s19 }
 0x242   : > { %s1765_s19 = smov %s1564_s25  ;;  %s1766_s20 = smov %s1554_s22 }
 0x243   :  { %16 = sbr.rel (!%p14_p1) target bundleno = 3 (0x3), region = 123 }
 0x248   :  { %1157 = vsyncpa [#allocation5], 1 }
 0x249   :  { %1159 = vsyncpa [#allocation5 + $0x1], 1 }
 0x24a   :  { %1160 = vsyncpa [#allocation6], 1 }
 0x24b   :  { %1162 = vsyncpa [#allocation6 + $0x1], 1 }

</bundles_post_ra>
